<compile_context>
chip_gen: v5e
topology: v5e:2x2
jax: 0.10.0
libtpu: 0.0.40
codegen_flags: <defaults>
</compile_context>

<pallas_src>
import math

import jax
import jax.numpy as jnp
from jax.experimental import pallas as pl
from jax.experimental.pallas import tpu as pltpu


def _pe_add_kernel(x_ref, pe_ref, o_ref):
    # x_ref : (TS, B, D) tile in VMEM
    # pe_ref: (TS, 1, D) tile in VMEM -> broadcast-add over the batch axis (VPU)
    o_ref[...] = (x_ref[...] + pe_ref[...].astype(x_ref.dtype)).astype(o_ref.dtype)


def make_pe(d_model: int, max_len: int = 5000, dtype=jnp.float32):
    """Deterministic buffer construction, mirroring PositionalEncoding.__init__."""
    if d_model % 2 != 0:
        raise ValueError("d_model must be even (same constraint as the PyTorch module)")
    position = jnp.arange(max_len, dtype=jnp.float32)[:, None]               # (max_len, 1)
    div_term = jnp.exp(
        jnp.arange(0, d_model, 2, dtype=jnp.float32) * (-math.log(10000.0) / d_model)
    )                                                                        # (d_model//2,)
    angles = position * div_term                                             # (max_len, d_model//2)
    pe = jnp.zeros((max_len, d_model), dtype=jnp.float32)
    pe = pe.at[:, 0::2].set(jnp.sin(angles))
    pe = pe.at[:, 1::2].set(jnp.cos(angles))
    # unsqueeze(0).transpose(0, 1)  ->  (max_len, 1, d_model)
    return pe[:, None, :].astype(dtype)


def _vmem_budget_bytes() -> int:
    """~1/3 of physical VMEM: big tiles, but double-buffering always survives."""
    try:
        cap = int(pltpu.get_tpu_info().vmem_capacity_bytes)
    except Exception:
        cap = 64 << 20  # conservative fallback: v7x per-TensorCore VMEM
    return cap // 3


def _choose_seq_tile(S: int, B: int, D: int, x_bytes: int, pe_bytes: int, budget: int) -> int:
    # Live VMEM per sequence row: double-buffered x-in + out tiles, plus pe tile.
    per_row = 2 * (2 * B * D * x_bytes) + 2 * D * pe_bytes
    ts = max(8, budget // max(per_row, 1))
    if ts < S and ts > 8:
        ts = (ts // 8) * 8  # keep the leading dim 8-aligned for clean sublanes
    return int(max(1, min(ts, S)))


def positional_encoding_forward(x: jax.Array, pe: jax.Array, *,
                                seq_tile: int | None = None,
                                donate_x: bool = False) -> jax.Array:
    """x: (S, B, D); pe: (max_len, 1, D).  Returns x + pe[:S].

    Note: for tiny inputs (a few KiB) a fused XLA `x + pe[:S]` is faster than
    any kernel dispatch; this wrapper always uses the Pallas path so the kernel
    is exercised.
    """
    S, B, D = x.shape
    max_len = pe.shape[0]
    if S > max_len:
        raise ValueError(f"sequence length {S} exceeds pe max_len {max_len}")
    if pe.shape != (max_len, 1, D):
        raise ValueError(f"pe shape {pe.shape} incompatible with x shape {x.shape}")

    budget = _vmem_budget_bytes()
    if seq_tile is None:
        ts = _choose_seq_tile(S, B, D, x.dtype.itemsize, pe.dtype.itemsize, budget)
    else:
        ts = int(max(1, min(seq_tile, S)))
    grid = (pl.cdiv(S, ts),)

    # Actual live VMEM (double-buffered x/out tiles + pe tiles) + headroom.
    buf_bytes = 2 * (2 * ts * B * D * x.dtype.itemsize) + 2 * ts * D * pe.dtype.itemsize
    vmem_limit = int(max(32 << 20, buf_bytes + (8 << 20)))

    return pl.pallas_call(
        _pe_add_kernel,
        out_shape=jax.ShapeDtypeStruct((S, B, D), x.dtype),
        grid_spec=pltpu.PrefetchScalarGridSpec(
            num_scalar_prefetch=0,
            grid=grid,
            in_specs=[
                # x: tiled over the sequence axis; (B, D) trailing dims are full
                # extent so the (8,128) rule always holds.
                pl.BlockSpec((ts, B, D), lambda i: (i, 0, 0)),
                # pe: full (max_len, 1, D) buffer; index_map selects the row
                # tile -- no pe[:S] materialized in HBM by the wrapper.
                pl.BlockSpec((ts, 1, D), lambda i: (i, 0, 0)),
            ],
            out_specs=pl.BlockSpec((ts, B, D), lambda i: (i, 0, 0)),
        ),
        compiler_params=pltpu.CompilerParams(
            dimension_semantics=("parallel",),  # shard S across v7x's 2 TCs
            vmem_limit_bytes=vmem_limit,
        ),
        # Optional in-place update: only enable when the caller no longer needs
        # x (e.g. inside a jitted step where x is donated/dead afterwards).
        input_output_aliases=({0: 0} if donate_x else {}),
    )(x, pe)


if __name__ == "__main__":
    # Case 1: small demo shapes consistent with the module (seq-first layout).
    seq_len, batch, d_model = 8, 2, 32
    max_len = 64  # small synthetic max_len (module default is 5000)

    key = jax.random.PRNGKey(0)
    x = jax.random.normal(key, (seq_len, batch, d_model), dtype=jnp.float32)
    pe = make_pe(d_model, max_len=max_len)

    out = jax.block_until_ready(positional_encoding_forward(x, pe))
    ref = x + pe[:seq_len]
    assert out.shape == (seq_len, batch, d_model)
    assert out.dtype == x.dtype
    assert jnp.allclose(out, ref, atol=1e-6, rtol=1e-6)

    # Case 2: multi-step grid with a ragged tail (exercises the pipeline path).
    s2, b2, d2 = 20, 2, 128
    x2 = jax.random.normal(jax.random.PRNGKey(1), (s2, b2, d2), dtype=jnp.float32)
    pe2 = make_pe(d2, max_len=max_len)
    out2 = jax.block_until_ready(positional_encoding_forward(x2, pe2, seq_tile=8))
    ref2 = x2 + pe2[:s2]
    assert jnp.allclose(out2, ref2, atol=1e-6, rtol=1e-6)

    print("KERNEL_OK")
</pallas_src>

<mosaic_0001>
module attributes {stable_mosaic.version = 11 : i64} {
  func.func @_pe_add_kernel(%arg0: i32, %arg1: memref<8x2x32xf32, #tpu.memory_space<vmem>>, %arg2: memref<8x1x32xf32, #tpu.memory_space<vmem>>, %arg3: memref<8x2x32xf32, #tpu.memory_space<vmem>>) attributes {dimension_semantics = [#tpu.dimension_semantics<parallel>], iteration_bounds = array<i64: 1>, scalar_prefetch = 0 : i64, scratch_operands = 0 : i64, tpu.core_type = #tpu.core_type<tc>, window_params = [{transform_indices = @transform_0, window_bounds = array<i64: 8, 2, 32>}, {transform_indices = @transform_1, window_bounds = array<i64: 8, 1, 32>}, {transform_indices = @transform_2, window_bounds = array<i64: 8, 2, 32>}]} {
    %c0 = arith.constant 0 : index
    %c0_0 = arith.constant 0 : index
    %c0_1 = arith.constant 0 : index
    %0 = vector.load %arg1[%c0, %c0_0, %c0_1] : memref<8x2x32xf32, #tpu.memory_space<vmem>>, vector<8x2x32xf32>
    %c0_2 = arith.constant 0 : index
    %c0_3 = arith.constant 0 : index
    %c0_4 = arith.constant 0 : index
    %1 = vector.load %arg2[%c0_2, %c0_3, %c0_4] : memref<8x1x32xf32, #tpu.memory_space<vmem>>, vector<8x1x32xf32>
    %2 = vector.broadcast %1 : vector<8x1x32xf32> to vector<8x2x32xf32>
    %3 = arith.addf %0, %2 : vector<8x2x32xf32>
    %c0_5 = arith.constant 0 : index
    %c0_6 = arith.constant 0 : index
    %c0_7 = arith.constant 0 : index
    %4 = vector.load %arg3[%c0_5, %c0_6, %c0_7] : memref<8x2x32xf32, #tpu.memory_space<vmem>>, vector<8x2x32xf32>
    tpu.vector_store %arg3[%c0_5, %c0_6, %c0_7], %3 {strides = array<i32>} : memref<8x2x32xf32, #tpu.memory_space<vmem>>, vector<8x2x32xf32>,
    return
  }
  func.func @transform_0(%arg0: i32) -> (i32, i32, i32) {
    %c0_i32 = arith.constant 0 : i32
    %c0_i32_0 = arith.constant 0 : i32
    %c0_i32_1 = arith.constant 0 : i32
    return %arg0, %c0_i32, %c0_i32_0 : i32, i32, i32
  }
  func.func @transform_1(%arg0: i32) -> (i32, i32, i32) {
    %c0_i32 = arith.constant 0 : i32
    %c0_i32_0 = arith.constant 0 : i32
    %c0_i32_1 = arith.constant 0 : i32
    return %arg0, %c0_i32, %c0_i32_0 : i32, i32, i32
  }
  func.func @transform_2(%arg0: i32) -> (i32, i32, i32) {
    %c0_i32 = arith.constant 0 : i32
    %c0_i32_0 = arith.constant 0 : i32
    %c0_i32_1 = arith.constant 0 : i32
    return %arg0, %c0_i32, %c0_i32_0 : i32, i32, i32
  }
}

</mosaic_0001>

<bundles_post_ra>
// kernel: tpu_custom_call.1
= control target key start
LH: loop header
LB: loop body
LE: loop exit
PB: predicated region body
PF: predicated region fallthrough
CT: control target
= control target key end

     0   :  { %vm60_vm0 = vcmask 254976   ;;  %s201_s0 = inlined_call_operand.vmem [shape: f32[8,2,32], index: 0, kind: input, shape index: {}]   ;;  %s202_s1 = inlined_call_operand.vmem [shape: f32[64,1,32], index: 1, kind: input, shape index: {}]   ;;  %s203_s2 = inlined_call_operand.hbm [shape: f32[8,2,32], index: 2, kind: output, shape index: {}]  }
   0x1   :  { %v12_v0 = vld [vmem:[%s201_s0] sm:$0x3]  ;;  %v13_v2 = vld [vmem:[%s201_s0 + $0x2] sm:$0x3]  ;;  %v14_v5 = vld [vmem:[%s201_s0 + $0x4] sm:$0x3] }
   0x2   :  { %v90_v1 = vld [vmem:[%s202_s1] ss:$0 sm:$0xff]  ;;  %v91_v4 = vld [vmem:[%s202_s1 + $0x1] ss:$0 sm:$0xff]  ;;  %v92_v6 = vld [vmem:[%s202_s1 + $0x2] ss:$0 sm:$0xff] }
   0x3   :  { %v52_v3 = vadd.f32 %v90_v1, %v12_v0  ;;  %v15_v7 = vld [vmem:[%s201_s0 + $0x6] sm:$0x3]  ;;  %v53_v8 = vadd.f32 %v91_v4, %v13_v2  ;;  %v93_v9 = vld [vmem:[%s202_s1 + $0x3] ss:$0 sm:$0xff]  ;;  %v16_v10 = vld [vmem:[%s201_s0 + $0x8] sm:$0x3]  ;;  %v54_v11 = vadd.f32 %v92_v6, %v14_v5 }
   0x4   :  { %v94_v12 = vld [vmem:[%s202_s1 + $0x4] ss:$0 sm:$0xff]  ;;  %v17_v13 = vld [vmem:[%s201_s0 + $0xa] sm:$0x3]  ;;  %v55_v14 = vadd.f32 %v93_v9, %v15_v7  ;;  %v95_v15 = vld [vmem:[%s202_s1 + $0x5] ss:$0 sm:$0xff] }
   0x5   :  { %61 = vst.msk [vmem:[#allocation2] sm:$0x3] %vm60_vm0, %v52_v3  ;;  %v56_v16 = vadd.f32 %v94_v12, %v16_v10  ;;  %v18_v17 = vld [vmem:[%s201_s0 + $0xc] sm:$0x3]  ;;  %v57_v18 = vadd.f32 %v95_v15, %v17_v13  ;;  %v96_v19 = vld [vmem:[%s202_s1 + $0x6] ss:$0 sm:$0xff] }
   0x6   :  { %62 = vst.msk [vmem:[#allocation2 + $0x2] sm:$0x3] %vm60_vm0, %v53_v8  ;;  %v19_v20 = vld [vmem:[%s201_s0 + $0xe] sm:$0x3]  ;;  %v97_v21 = vld [vmem:[%s202_s1 + $0x7] ss:$0 sm:$0xff]  ;;  %v58_v22 = vadd.f32 %v96_v19, %v18_v17 }
   0x7   :  { %63 = vst.msk [vmem:[#allocation2 + $0x4] sm:$0x3] %vm60_vm0, %v54_v11 }
   0x8   :  { %64 = vst.msk [vmem:[#allocation2 + $0x6] sm:$0x3] %vm60_vm0, %v55_v14 }
   0x9   :  { %65 = vst.msk [vmem:[#allocation2 + $0x8] sm:$0x3] %vm60_vm0, %v56_v16 }
   0xa   :  { %66 = vst.msk [vmem:[#allocation2 + $0xa] sm:$0x3] %vm60_vm0, %v57_v18 }
   0xb   :  { %7 = vsyncpa [#allocation3], 0  ;;  %s124_s13 = smov [#allocation2]   ;;  %s75_s17 = sshll.u32 %s203_s2, 4  ;;  %v59_v23 = vadd.f32 %v97_v21, %v19_v20  ;;  %67 = vst.msk [vmem:[#allocation2 + $0xc] sm:$0x3] %vm60_vm0, %v58_v22  ;;  %s76_s17 = int_to_ptr.hbm [resolvable:$true] %s75_s17 }
   0xc   :  { %s73_s14 = sshll.u32 %s124_s13, 4  ;;  %s125_s0 = smov 32   ;;  %s74_s14 = int_to_ptr.vmem [resolvable:$true] %s73_s14 }
   0xd   :  { %68 = vst.msk [vmem:[#allocation2 + $0xe] sm:$0x3] %vm60_vm0, %v59_v23  ;;  %s126_s18 = smov 2  }
   0xe   :  { %81 = dma.vmem_to_hbm [thread:$0]  %s74_s14, 256, %s76_s17, [#allocation3], %s125_s0, %s125_s0, %s126_s18  }
   0xf   :  { %122 = dma.done.wait [#allocation3], 256  }
  0x10   :  { %123 = vsyncadd [#allocation3], 4294967040 }
  0x11   :  { %86 = vsyncpa [#allocation3], 1 }

</bundles_post_ra>
